<compile_context>
chip_gen: v5e
topology: v5e:2x2
jax: 0.10.0
libtpu: 0.0.40
codegen_flags: <defaults>
</compile_context>

<pallas_src>
import jax
import jax.numpy as jnp
from jax.experimental import pallas as pl
from jax.experimental.pallas import tpu as pltpu


# ---------------------------------------------------------------------------
# Fully fused Pallas kernel:
#   (folded backbone + Linear 120->32) -> ReLU -> Linear 32->2 -> CrossEntropy
# Single grid point; all operands live whole in VMEM; loss goes out via SMEM.
# ---------------------------------------------------------------------------
def classifier_kernel(mri_ref, pet_ref, csf_ref, lbl_ref,
                      wm_ref, wp_ref, wc_ref, bf_ref, w2_ref, b2_ref,
                      logits_ref, loss_ref):
    # First layer with the backbone projections algebraically folded in:
    #   fuse_feat @ W1 + b1 == mri@(w_mri@W1[:40]) + pet@(w_pet@W1[40:80])
    #                        + csf@(w_csf@W1[80:]) + b_fused
    h = (jnp.dot(mri_ref[...], wm_ref[...], preferred_element_type=jnp.float32)
         + jnp.dot(pet_ref[...], wp_ref[...], preferred_element_type=jnp.float32)
         + jnp.dot(csf_ref[...], wc_ref[...], preferred_element_type=jnp.float32)
         + bf_ref[...])
    h = jnp.maximum(h, 0.0)                                          # ReLU (f32 VPU)
    logits = jnp.dot(h, w2_ref[...],
                     preferred_element_type=jnp.float32) + b2_ref[...]   # [B, 2]
    logits_ref[...] = logits

    # CrossEntropyLoss (mean reduction), numerically stable log-sum-exp.
    m = jnp.max(logits, axis=-1, keepdims=True)                      # [B, 1]
    lse = m + jnp.log(jnp.sum(jnp.exp(logits - m), axis=-1, keepdims=True))
    col = jax.lax.broadcasted_iota(jnp.int32, logits.shape, 1)       # [B, 2]
    picked = jnp.sum(jnp.where(col == lbl_ref[...], logits, 0.0),
                     axis=-1, keepdims=True)                         # [B, 1]
    per_row = lse - picked                                           # [B, 1]
    loss_ref[0] = jnp.sum(per_row) * (1.0 / logits.shape[0])         # scalar -> SMEM


def classifier_forward(folded, mri, pet, csf, label_):
    """Returns (logits [B,2], mean CE loss scalar), matching Classifier.forward."""
    B = mri.shape[0]
    vmem = pl.BlockSpec(memory_space=pltpu.MemorySpace.VMEM)
    lbl = label_.astype(jnp.int32).reshape(B, 1)
    logits, loss = pl.pallas_call(
        classifier_kernel,
        out_shape=(
            jax.ShapeDtypeStruct((B, 2), jnp.float32),   # logits
            jax.ShapeDtypeStruct((1,), jnp.float32),     # CE loss (SMEM scalar)
        ),
        grid=(),
        in_specs=[vmem] * 10,
        out_specs=(
            vmem,
            pl.BlockSpec(memory_space=pltpu.MemorySpace.SMEM),
        ),
    )(mri.astype(jnp.float32), pet.astype(jnp.float32), csf.astype(jnp.float32),
      lbl,
      folded["w_mri_f"], folded["w_pet_f"], folded["w_csf_f"],
      folded["b_fused"], folded["w2"], folded["b2"])
    return logits, loss[0]


# ---------------------------------------------------------------------------
# Synthetic "backbone": one linear projection per modality -> 40-d latents each
# (3 x 40 = 120, matching MLP input_size=120).
# TODO(synk): the real backbone is external to this module; it is linear here,
# which is what makes the algebraic fold below exact. A nonlinear backbone
# would instead be fused by computing its latents inside the kernel.
# ---------------------------------------------------------------------------
def fold_backbone_into_mlp(params):
    """Precompute once; reused every step."""
    w1 = params["w1"]                                  # [120, 32]
    w_mri_f = params["w_mri"] @ w1[0:40]               # [32, 32]
    w_pet_f = params["w_pet"] @ w1[40:80]              # [32, 32]
    w_csf_f = params["w_csf"] @ w1[80:120]             # [16, 32]
    b_fused = (params["b1"]
               + params["b_mri"] @ w1[0:40]
               + params["b_pet"] @ w1[40:80]
               + params["b_csf"] @ w1[80:120])         # [1, 32]
    return dict(w_mri_f=w_mri_f, w_pet_f=w_pet_f, w_csf_f=w_csf_f,
                b_fused=b_fused, w2=params["w2"], b2=params["b2"])


def init_params(key):
    ks = jax.random.split(key, 10)
    def lin(kw, kb, fan_in, fan_out):
        bound = 1.0 / jnp.sqrt(fan_in)
        w = jax.random.uniform(kw, (fan_in, fan_out), jnp.float32, -bound, bound)
        b = jax.random.uniform(kb, (1, fan_out), jnp.float32, -bound, bound)
        return w, b
    w_mri, b_mri = lin(ks[0], ks[1], 32, 40)
    w_pet, b_pet = lin(ks[2], ks[3], 32, 40)
    w_csf, b_csf = lin(ks[4], ks[5], 16, 40)
    w1, b1 = lin(ks[6], ks[7], 120, 32)   # MLP: Linear(120, 32)
    w2, b2 = lin(ks[8], ks[9], 32, 2)     # MLP: Linear(32, 2)
    return dict(w_mri=w_mri, b_mri=b_mri, w_pet=w_pet, b_pet=b_pet,
                w_csf=w_csf, b_csf=b_csf, w1=w1, b1=b1, w2=w2, b2=b2)


if __name__ == "__main__":
    key = jax.random.PRNGKey(0)
    k_p, k_mri, k_pet, k_csf, k_lbl = jax.random.split(key, 5)
    params = init_params(k_p)
    folded = fold_backbone_into_mlp(params)   # precompute once, reuse per step

    B = 2
    mri = jax.random.normal(k_mri, (B, 32), jnp.float32)
    pet = jax.random.normal(k_pet, (B, 32), jnp.float32)
    csf = jax.random.normal(k_csf, (B, 16), jnp.float32)
    label_ = jax.random.randint(k_lbl, (B,), 0, 2, jnp.int32)

    logits, ce_loss = classifier_forward(folded, mri, pet, csf, label_)
    jax.block_until_ready((logits, ce_loss))

    # sanity check against an unfused pure-JAX reference (original op ordering)
    mri_lat = mri @ params["w_mri"] + params["b_mri"]
    pet_lat = pet @ params["w_pet"] + params["b_pet"]
    csf_lat = csf @ params["w_csf"] + params["b_csf"]
    fuse = jnp.concatenate((mri_lat, pet_lat, csf_lat), axis=1)        # [B, 120]
    h_ref = jnp.maximum(fuse @ params["w1"] + params["b1"], 0.0)
    logits_ref = h_ref @ params["w2"] + params["b2"]
    lse_ref = jax.nn.logsumexp(logits_ref, axis=-1)
    loss_ref = jnp.mean(lse_ref - logits_ref[jnp.arange(B), label_])
    assert jnp.allclose(logits, logits_ref, atol=1e-4)
    assert jnp.allclose(ce_loss, loss_ref, atol=1e-4)

    print("KERNEL_OK")
</pallas_src>

<mosaic_0001>
module attributes {stable_mosaic.version = 11 : i64} {
  func.func @classifier_kernel(%arg0: memref<2x32xf32, #tpu.memory_space<vmem>>, %arg1: memref<2x32xf32, #tpu.memory_space<vmem>>, %arg2: memref<2x16xf32, #tpu.memory_space<vmem>>, %arg3: memref<2x1xi32, #tpu.memory_space<vmem>>, %arg4: memref<32x32xf32, #tpu.memory_space<vmem>>, %arg5: memref<32x32xf32, #tpu.memory_space<vmem>>, %arg6: memref<16x32xf32, #tpu.memory_space<vmem>>, %arg7: memref<1x32xf32, #tpu.memory_space<vmem>>, %arg8: memref<32x2xf32, #tpu.memory_space<vmem>>, %arg9: memref<1x2xf32, #tpu.memory_space<vmem>>, %arg10: memref<2x2xf32, #tpu.memory_space<vmem>>, %arg11: memref<1xf32, #tpu.memory_space<smem>>) attributes {dimension_semantics = [], scalar_prefetch = 0 : i64, scratch_operands = 0 : i64, tpu.core_type = #tpu.core_type<tc>} {
    %c0 = arith.constant 0 : index
    %c0_0 = arith.constant 0 : index
    %0 = vector.load %arg0[%c0, %c0_0] : memref<2x32xf32, #tpu.memory_space<vmem>>, vector<2x32xf32>
    %c0_1 = arith.constant 0 : index
    %c0_2 = arith.constant 0 : index
    %1 = vector.load %arg4[%c0_1, %c0_2] : memref<32x32xf32, #tpu.memory_space<vmem>>, vector<32x32xf32>
    %cst = arith.constant dense<0.000000e+00> : vector<2x32xf32>
    %2 = tpu.matmul %0, %1, %cst {dimension_numbers = #tpu.dot_dimension_numbers<[1], [0], [0], [1], [0, 0, 1, 1], [], []>} : vector<2x32xf32>, vector<32x32xf32>, vector<2x32xf32> -> vector<2x32xf32>
    %c0_3 = arith.constant 0 : index
    %c0_4 = arith.constant 0 : index
    %3 = vector.load %arg1[%c0_3, %c0_4] : memref<2x32xf32, #tpu.memory_space<vmem>>, vector<2x32xf32>
    %c0_5 = arith.constant 0 : index
    %c0_6 = arith.constant 0 : index
    %4 = vector.load %arg5[%c0_5, %c0_6] : memref<32x32xf32, #tpu.memory_space<vmem>>, vector<32x32xf32>
    %cst_7 = arith.constant dense<0.000000e+00> : vector<2x32xf32>
    %5 = tpu.matmul %3, %4, %cst_7 {dimension_numbers = #tpu.dot_dimension_numbers<[1], [0], [0], [1], [0, 0, 1, 1], [], []>} : vector<2x32xf32>, vector<32x32xf32>, vector<2x32xf32> -> vector<2x32xf32>
    %6 = arith.addf %2, %5 : vector<2x32xf32>
    %c0_8 = arith.constant 0 : index
    %c0_9 = arith.constant 0 : index
    %7 = vector.load %arg2[%c0_8, %c0_9] : memref<2x16xf32, #tpu.memory_space<vmem>>, vector<2x16xf32>
    %c0_10 = arith.constant 0 : index
    %c0_11 = arith.constant 0 : index
    %8 = vector.load %arg6[%c0_10, %c0_11] : memref<16x32xf32, #tpu.memory_space<vmem>>, vector<16x32xf32>
    %cst_12 = arith.constant dense<0.000000e+00> : vector<2x32xf32>
    %9 = tpu.matmul %7, %8, %cst_12 {dimension_numbers = #tpu.dot_dimension_numbers<[1], [0], [0], [1], [0, 0, 1, 1], [], []>} : vector<2x16xf32>, vector<16x32xf32>, vector<2x32xf32> -> vector<2x32xf32>
    %10 = arith.addf %6, %9 : vector<2x32xf32>
    %c0_13 = arith.constant 0 : index
    %c0_14 = arith.constant 0 : index
    %11 = vector.load %arg7[%c0_13, %c0_14] : memref<1x32xf32, #tpu.memory_space<vmem>>, vector<1x32xf32>
    %12 = vector.broadcast %11 : vector<1x32xf32> to vector<2x32xf32>
    %13 = arith.addf %10, %12 : vector<2x32xf32>
    %cst_15 = arith.constant 0.000000e+00 : f32
    %14 = vector.broadcast %cst_15 : f32 to vector<2x32xf32>
    %15 = arith.maximumf %13, %14 : vector<2x32xf32>
    %c0_16 = arith.constant 0 : index
    %c0_17 = arith.constant 0 : index
    %16 = vector.load %arg8[%c0_16, %c0_17] : memref<32x2xf32, #tpu.memory_space<vmem>>, vector<32x2xf32>
    %cst_18 = arith.constant dense<0.000000e+00> : vector<2x2xf32>
    %17 = tpu.matmul %15, %16, %cst_18 {dimension_numbers = #tpu.dot_dimension_numbers<[1], [0], [0], [1], [0, 0, 1, 1], [], []>} : vector<2x32xf32>, vector<32x2xf32>, vector<2x2xf32> -> vector<2x2xf32>
    %c0_19 = arith.constant 0 : index
    %c0_20 = arith.constant 0 : index
    %18 = vector.load %arg9[%c0_19, %c0_20] : memref<1x2xf32, #tpu.memory_space<vmem>>, vector<1x2xf32>
    %19 = vector.broadcast %18 : vector<1x2xf32> to vector<2x2xf32>
    %20 = arith.addf %17, %19 : vector<2x2xf32>
    %c0_21 = arith.constant 0 : index
    %c0_22 = arith.constant 0 : index
    %21 = vector.load %arg10[%c0_21, %c0_22] : memref<2x2xf32, #tpu.memory_space<vmem>>, vector<2x2xf32>
    tpu.vector_store %arg10[%c0_21, %c0_22], %20 {strides = array<i32>} : memref<2x2xf32, #tpu.memory_space<vmem>>, vector<2x2xf32>,
    %cst_23 = arith.constant dense<0xFF800000> : vector<2xf32>
    %22 = vector.multi_reduction <maximumf>, %20, %cst_23 [1] : vector<2x2xf32> to vector<2xf32>
    %23 = vector.shape_cast %22 : vector<2xf32> to vector<2x1xf32>
    %24 = vector.broadcast %23 : vector<2x1xf32> to vector<2x2xf32>
    %25 = arith.subf %20, %24 : vector<2x2xf32>
    %26 = math.exp %25 : vector<2x2xf32>
    %cst_24 = arith.constant dense<0.000000e+00> : vector<2xf32>
    %27 = vector.multi_reduction <add>, %26, %cst_24 [1] : vector<2x2xf32> to vector<2xf32>
    %28 = vector.shape_cast %27 : vector<2xf32> to vector<2x1xf32>
    %29 = math.log %28 : vector<2x1xf32>
    %30 = arith.addf %23, %29 : vector<2x1xf32>
    %31 = tpu.iota {dimensions = array<i32: 1>} : vector<2x2xi32>
    %c0_25 = arith.constant 0 : index
    %c0_26 = arith.constant 0 : index
    %32 = vector.load %arg3[%c0_25, %c0_26] : memref<2x1xi32, #tpu.memory_space<vmem>>, vector<2x1xi32>
    %33 = vector.broadcast %32 : vector<2x1xi32> to vector<2x2xi32>
    %34 = arith.cmpi eq, %31, %33 : vector<2x2xi32>
    %cst_27 = arith.constant 0.000000e+00 : f32
    %35 = vector.broadcast %cst_27 : f32 to vector<2x2xf32>
    %36 = arith.select %34, %20, %35 : vector<2x2xi1>, vector<2x2xf32>
    %cst_28 = arith.constant dense<0.000000e+00> : vector<2xf32>
    %37 = vector.multi_reduction <add>, %36, %cst_28 [1] : vector<2x2xf32> to vector<2xf32>
    %38 = vector.shape_cast %37 : vector<2xf32> to vector<2x1xf32>
    %39 = arith.subf %30, %38 : vector<2x1xf32>
    %40 = vector.shape_cast %39 : vector<2x1xf32> to vector<1x2x1xf32>
    %cst_29 = arith.constant dense<0.000000e+00> : vector<1xf32>
    %41 = vector.multi_reduction <add>, %40, %cst_29 [1, 2] : vector<1x2x1xf32> to vector<1xf32>
    %42 = vector.shape_cast %41 : vector<1xf32> to vector<1x1x1xf32>
    %43 = vector.extract %42[0, 0, 0] : f32 from vector<1x1x1xf32>
    %cst_30 = arith.constant 5.000000e-01 : f32
    %44 = arith.mulf %43, %cst_30 : f32
    %c0_31 = arith.constant 0 : index
    %45 = memref.load %arg11[%c0_31] : memref<1xf32, #tpu.memory_space<smem>>
    memref.store %44, %arg11[%c0_31] : memref<1xf32, #tpu.memory_space<smem>>
    return
  }
}

</mosaic_0001>

<bundles_post_ra>
// kernel: tpu_custom_call.1
= control target key start
LH: loop header
LB: loop body
LE: loop exit
PB: predicated region body
PF: predicated region fallthrough
CT: control target
= control target key end

     0   :  { %17 = vsyncpa [#allocation3], 0  ;;  %s588_s0 = inlined_call_operand.vmem [shape: f32[2,32], index: 0, kind: input, shape index: {}]   ;;  %s589_s1 = inlined_call_operand.hbm [shape: f32[2,32], index: 1, kind: input, shape index: {}]   ;;  %s590_s2 = inlined_call_operand.hbm [shape: f32[2,16], index: 2, kind: input, shape index: {}]   ;;  %s591_s3 = inlined_call_operand.vmem [shape: s32[2,1], index: 3, kind: input, shape index: {}]   ;;  %s592_s4 = inlined_call_operand.vmem [shape: f32[32,32], index: 4, kind: input, shape index: {}]   ;;  %s593_s5 = inlined_call_operand.hbm [shape: f32[32,32], index: 5, kind: input, shape index: {}]   ;;  %s594_s6 = inlined_call_operand.hbm [shape: f32[16,32], index: 6, kind: input, shape index: {}]   ;;  %s595_s7 = inlined_call_operand.vmem [shape: f32[1,32], index: 7, kind: input, shape index: {}]   ;;  %s596_s8 = inlined_call_operand.vmem [shape: f32[32,2], index: 8, kind: input, shape index: {}]   ;;  %s597_s9 = inlined_call_operand.vmem [shape: f32[1,2], index: 9, kind: input, shape index: {}]   ;;  %s598_s10 = inlined_call_operand.hbm [shape: f32[2,2], index: 10, kind: output, shape index: {0}]   ;;  %s599_s11 = inlined_call_operand.hbm [shape: f32[1], index: 11, kind: output, shape index: {1}]  }
   0x1   :  { %18 = vsyncpa [#allocation7], 0 }
   0x2   :  { %19 = vsyncpa [#allocation10], 0 }
   0x3   :  { %20 = vsyncpa [#allocation4], 0  ;;  %s40_s19 = sshll.u32 %s590_s2, 4  ;;  %s41_s19 = int_to_ptr.hbm [resolvable:$true] %s40_s19 }
   0x4   :  { %21 = vsyncpa [#allocation5], 0  ;;  %s458_s20 = smov [#allocation6]   ;;  %s29_s24 = sshll.u32 %s589_s1, 4  ;;  %s30_s24 = int_to_ptr.hbm [resolvable:$true] %s29_s24 }
   0x5   :  { %s42_s21 = sshll.u32 %s458_s20, 4  ;;  %s459_s25 = smov [#allocation2]   ;;  %s43_s21 = int_to_ptr.vmem [resolvable:$true] %s42_s21 }
   0x6   :  { %45 = dma.hbm_to_vmem [thread:$0]  %s41_s19, 32, %s43_s21, [#allocation7]  }
   0x7   :  { %s31_s26 = sshll.u32 %s459_s25, 4  ;;  %s54_s29 = sshll.u32 %s593_s5, 4  ;;  %s32_s26 = int_to_ptr.vmem [resolvable:$true] %s31_s26  ;;  %s55_s29 = int_to_ptr.hbm [resolvable:$true] %s54_s29 }
   0x8   :  { %34 = dma.hbm_to_vmem [thread:$0]  %s30_s24, 32, %s32_s26, [#allocation3]  }
   0x9   :  { %s460_s2 = smov [#allocation8]   ;;  %s67_s14 = sshll.u32 %s594_s6, 4  ;;  %s68_s14 = int_to_ptr.hbm [resolvable:$true] %s67_s14 }
   0xa   :  { %s56_s30 = sshll.u32 %s460_s2, 4  ;;  %s461_s15 = smov 128   ;;  %s57_s30 = int_to_ptr.vmem [resolvable:$true] %s56_s30 }
   0xb   :  { %s462_s1 = smov 8   ;;  %s463_s16 = smov [#allocation9]  }
   0xc   :  { %62 = dma.hbm_to_vmem [thread:$0]  %s55_s29, 512, %s57_s30, [#allocation7], %s461_s15, %s461_s15, %s462_s1  }
   0xd   :  { %s69_s17 = sshll.u32 %s463_s16, 4  ;;  %s70_s17 = int_to_ptr.vmem [resolvable:$true] %s69_s17 }
   0xe   :  { %75 = dma.hbm_to_vmem [thread:$0]  %s68_s14, 256, %s70_s17, [#allocation10], %s461_s15, %s461_s15, %s462_s1  }
   0xf   :  { %448 = dma.done.wait [#allocation3], 32  }
  0x10   :  { %449 = vsyncadd [#allocation3], 4294967264 }
  0x11   :  { %450 = dma.done.wait [#allocation7], 544  }
  0x12   :  { %451 = vsyncadd [#allocation7], 4294966752 }
  0x13   :  { %452 = dma.done.wait [#allocation10], 256  }
  0x14   :  { %453 = vsyncadd [#allocation10], 4294967040  ;;  %v107_v0 = vld [vmem:[#allocation8 + $0x18] sm:$0xff]  ;;  %v157_v2 = vld [vmem:[#allocation9 + $0x8] sm:$0xff]  ;;  %vm158_vm0 = vcmask 130048   ;;  %vm108_vm1 = vcmask 261120   ;;  %v234_v36 = vlaneseq }
  0x15   :  { %v102_v1 = vld [vmem:[%s592_s4 + $0x18] sm:$0xff]  ;;  %124 = vmatpush.msra.mxu0 %v107_v0  ;;  %v101_v4 = vld [vmem:[%s592_s4 + $0x10] sm:$0xff]  ;;  %v156_v5 = vld [vmem:[#allocation9] sm:$0xff]  ;;  %176 = vmatpush.msra.mxu2 %v157_v2  ;;  %v464_v25 = vmov 0   ;;  %vm220_vm2 = vcmask 9216   ;;  %vm246_vm4 = vcmask 1024  }
  0x16   :  { %147 = vmatpush.msra.mxu1 %v102_v1  ;;  %v106_v3 = vld [vmem:[#allocation8 + $0x10] sm:$0xff]  ;;  %v155_v6 = vld [vmem:[#allocation6] sm:$0x3]  ;;  %v105_v7 = vld [vmem:[#allocation8 + $0x8] sm:$0xff]  ;;  %309 = vset.pattern.permute.xlu0 %v464_v25  ;;  %v235_v37 = vand.u32 127, %v234_v36  ;;  %s267_s17 = sshll.u32 %s598_s10, 4  ;;  %s268_s17 = int_to_ptr.hbm [resolvable:$true] %s267_s17 }
  0x17   :  { %125 = vmatpush.msra.mxu0 %v106_v3  ;;  %v100_v8 = vld [vmem:[%s592_s4 + $0x8] sm:$0xff]  ;;  %177 = vmatpush.msra.mxu2 %v156_v5  ;;  %v99_v10 = vld [vmem:[%s592_s4] sm:$0xff]  ;;  %v192_v13 = vld [vmem:[%s596_s8 + $0x18] sm:$0xff]  ;;  %s276_s6 = sshll.u32 %s599_s11, 4  ;;  %s466_s10 = smov [#allocation12]   ;;  %s277_s6 = int_to_ptr.hbm [resolvable:$true] %s276_s6 }
  0x18   :  { %148 = vmatpush.msra.mxu1 %v101_v4  ;;  %v104_v9 = vld [vmem:[#allocation8] sm:$0xff]  ;;  %296 = vmatmul.msk.f32.vlgmr.msra.gmra.mxu2 %vm158_vm0, %v155_v6  ;;  %v103_v11 = vld [vmem:[#allocation2] sm:$0x3]  ;;  %v191_v14 = vld [vmem:[%s596_s8 + $0x10] sm:$0xff] }
  0x19   :  { %126 = vmatpush.msra.mxu0 %v105_v7  ;;  %v98_v12 = vld [vmem:[%s588_s0] sm:$0x3]  ;;  %212 = vmatpush.msra.mxu3 %v192_v13  ;;  %v190_v15 = vld [vmem:[%s596_s8 + $0x8] sm:$0xff] }
  0x1a   :  { %149 = vmatpush.msra.mxu1 %v100_v8  ;;  %v189_v16 = vld [vmem:[%s596_s8] sm:$0xff] }
  0x1b   :  { %127 = vmatpush.msra.mxu0 %v104_v9  ;;  %213 = vmatpush.msra.mxu3 %v191_v14  ;;  %v310_v20 = vld [vmem:[%s595_s7] ss:$0 sm:$0xff] }
  0x1c   :  { %150 = vmatpush.msra.mxu1 %v99_v10  ;;  %294 = vmatmul.msk.f32.vlgmr.msra.gmra.mxu0 %vm108_vm1, %v103_v11  ;;  %v311_v26 = vld [vmem:[%s597_s9] ss:$0 sm:$0xff] }
  0x1d   :  { %295 = vmatmul.msk.f32.vlgmr.msra.gmra.mxu1 %vm108_vm1, %v98_v12  ;;  %214 = vmatpush.msra.mxu3 %v190_v15  ;;  %v236_v30 = vld [vmem:[%s591_s3] sm:$0x3]  ;;  %s465_s3 = smov [#allocation11]  }
  0x1e   :  { %s265_s9 = sshll.u32 %s465_s3, 4  ;;  %s266_s9 = int_to_ptr.vmem [resolvable:$true] %s265_s9 }
  0x1f   :  { %215 = vmatpush.msra.mxu3 %v189_v16 }
  0x99   :  { %v129_v17 = vpop.f32.mrf.mxu0 }
  0x9a   :  { %v152_v18 = vpop.f32.mrf.mxu1 }
  0x9b   :  { %v153_v19 = vadd.f32 %v152_v18, %v129_v17  ;;  %v179_v21 = vpop.f32.mrf.mxu2 }
  0x9d   :  { %v182_v22 = vadd.f32 %v179_v21, %v153_v19 }
  0x9f   :  { %v187_v23 = vadd.f32 %v310_v20, %v182_v22 }
  0xa1   :  { %v188_v24 = vmax.f32 %v187_v23, 0.0 }
  0xa3   :  { %297 = vmatmul.msk.f32.vlgmr.msra.gmra.mxu3 %vm108_vm1, %v188_v24 }
 0x126   :  { %v217_v27 = vpop.f32.mrf.mxu3 }
 0x127   :  { %v218_v28 = vadd.f32 %v311_v26, %v217_v27 }
 0x129   :  { %v222_v29 = vsel %vm220_vm2, %v218_v28, -inf  ;;  %221 = vst.msk [vmem:[#allocation11] sm:$0x3] %vm220_vm2, %v218_v28 }
 0x12a   :  { %223 = vmax.xlane.f32.xlu0 %v222_v29  ;;  %270 = dma.vmem_to_hbm [thread:$0]  %s266_s9, 32, %s268_s17, [#allocation4]  }
 0x13e   :  { %238 = vperm.xlu0 %309, %v236_v30  }
 0x19d   :  { %v224_v31 = vpop.xlane.xlu0 %223 }
 0x19e   :  { %v225_v32 = vsub.f32 %v218_v28, %v224_v31 }
 0x1a0   :  { %v226_v33 = vmul.f32 1.442695, %v225_v32 }
 0x1a2   :  { %312 = vpow2.f32 %v226_v33 }
 0x1a8   :  { %v313_v34 = vpop.eup %312 }
 0x1a9   :  { %v228_v35 = vsel %vm220_vm2, %v313_v34, 0.0 }
 0x1aa   :  { %229 = vadd.xlane.f32.xlu1 %v228_v35 }
 0x1b0   :  { %v239_v38 = vpop.permute.xlu0 %238 }
 0x1b1   :  { %vm240_vm3 = vcmp.eq.s32.totalorder %v235_v37, %v239_v38 }
 0x1b2   :  { %v241_v39 = vsel %vm240_vm3, %v218_v28, 0.0 }
 0x1b3   :  { %v242_v40 = vsel %vm220_vm2, %v241_v39, 0.0 }
 0x1b4   :  { %243 = vadd.xlane.f32.xlu1 %v242_v40 }
 0x21d   :  { %v230_v41 = vpop.xlane.xlu1 %229 }
 0x21e   :  { %314 = vlog2.f32 %v230_v41 }
 0x224   :  { %v315_v42 = vpop.eup %314 }
 0x225   :  { %v232_v43 = vmul.f32 0.6931472, %v315_v42 }
 0x227   :  { %v233_v44 = vadd.f32 %v232_v43, %v224_v31  ;;  %v244_v45 = vpop.xlane.xlu1 %243 }
 0x229   :  { %v245_v46 = vsub.f32 %v233_v44, %v244_v45 }
 0x22b   :  { %v247_v47 = vsel %vm246_vm4, %v245_v46, 0.0 }
 0x22c   :  { %248 = vadd.xlane.f32.xlu2 %v247_v47 }
 0x29f   :  { %v249_v48 = vpop.xlane.xlu2 %248 }
 0x2a0   :  { %v250_v49 = vrot.slane %v249_v48, 4 }
 0x2a2   :  { %v251_v50 = vadd.f32 %v250_v49, %v249_v48 }
 0x2a4   :  { %v252_v51 = vrot.slane %v251_v50, 2 }
 0x2a6   :  { %v253_v52 = vadd.f32 %v252_v51, %v251_v50 }
 0x2a8   :  { %v254_v53 = vrot.slane %v253_v52, 1 }
 0x2aa   :  { %v255_v54 = vadd.f32 %v254_v53, %v253_v52 }
 0x2ac   :  { %298 = vpush %v255_v54 }
 0x2dd   :  { %s299_s19 = spop %298 }
 0x2de   :  { %s257_s20 = smul.f32 0.5, %s299_s19 }
 0x2e0   :  { %259 = sst [smem:[#allocation12]] %s257_s20 }
 0x2e1   :  { %279 = dma.smem_to_hbm %s466_s10, 16, %s277_s6, [#allocation5]  }
 0x2e2   :  { %454 = dma.done.wait [#allocation4], 32  }
 0x2e3   :  { %455 = vsyncadd [#allocation4], 4294967264 }
 0x2e4   :  { %456 = dma.done.wait [#allocation5], 16  }
 0x2e5   :  { %457 = vsyncadd [#allocation5], 4294967280 }
 0x2e6   :  { %288 = sfence }
 0x2e7   :  { %289 = vsyncpa [#allocation3], 1 }
 0x2e8   :  { %290 = vsyncpa [#allocation7], 1 }
 0x2e9   :  { %291 = vsyncpa [#allocation10], 1 }
 0x2ea   :  { %292 = vsyncpa [#allocation4], 1 }
 0x2eb   :  { %293 = vsyncpa [#allocation5], 1 }

</bundles_post_ra>
